<compile_context>
chip_gen: v7x
topology: tpu7x:2x2x1
jax: 0.10.0
libtpu: 0.0.40
codegen_flags: <defaults>
</compile_context>

<pallas_src>
import jax
import jax.numpy as jnp
from jax.experimental import pallas as pl
from jax.experimental.pallas import tpu as pltpu


def _round_up(x, m):
    return (x + m - 1) // m * m


# ---------------------------------------------------------------------------
# Kernel 1: node projection  msg = x @ W + b  (f32 compute, bf16 output).
# Runs once per node (hoisted out of the aggregation row-tile loop).
# ---------------------------------------------------------------------------
def _project_kernel(x_ref, w_ref, b_ref, msg_ref):
    # x_ref:   (1, TP, c_in)     f32 row tile of the node features
    # w_ref:   (c_in, c_out_p)   f32 projection weight (resident)
    # b_ref:   (1, c_out_p)      f32 projection bias   (resident)
    # msg_ref: (1, TP, c_out_p)  bf16 projected messages
    msg = jnp.dot(x_ref[0], w_ref[...], preferred_element_type=jnp.float32)
    msg = msg + b_ref[...]
    # Single f32 -> bf16 cast per node, outside the aggregation loop.
    msg_ref[0] = msg.astype(jnp.bfloat16)


# ---------------------------------------------------------------------------
# Kernel 2: neighborhood aggregation + mean normalization + ReLU.
# ---------------------------------------------------------------------------
def _aggregate_kernel(adj_ref, msg_ref, o_ref):
    # adj_ref: (1, TQ, N)        adjacency row tile, bf16 (or int8, widened here)
    # msg_ref: (1, N, c_out_p)   bf16 projected messages (resident per batch)
    # o_ref:   (1, TQ, c_out_p)  f32 output row tile
    adj = adj_ref[0]
    if adj.dtype != jnp.bfloat16:          # static dtype check (e.g. int8 stream)
        adj = adj.astype(jnp.bfloat16)

    # MXU: bf16 x bf16 with f32 accumulation.
    agg = jnp.dot(adj, msg_ref[0], preferred_element_type=jnp.float32)  # (TQ, c_out_p)

    # Degree of each output row, accumulated in f32 (exact for 0/1 entries).
    deg = jnp.sum(adj, axis=1, keepdims=True, dtype=jnp.float32)        # (TQ, 1)
    # Guard padded (all-zero) rows: output 0 instead of inf/NaN.
    deg = jnp.maximum(deg, 1.0)
    agg = agg * pl.reciprocal(deg, approx=True)                         # EUP slot

    # ReLU (module's default activation).
    o_ref[0] = jnp.maximum(agg, 0.0)


def gcn_layer(node_feats, adjacency, w, b, *, row_tile=256,
              vmem_budget_bytes=28 * 1024 * 1024):
    """GCNLayer forward.

    node_feats: (B, N, c_in) float
    adjacency:  (B, N, N); pass it already in bf16 (or int8) to avoid an extra
                HBM cast pass over the largest tensor (0/1 entries are exact).
    w: (c_in, c_out), b: (c_out,)

    row_tile may be raised to 512 on v5e/v6e (128 MiB VMEM); the default 256
    plus the auto-shrink below keeps v7x (64 MiB/TC) safe.
    """
    B, N, c_in = node_feats.shape
    c_out = w.shape[1]
    c_out_p = _round_up(c_out, 128)        # lane-dense matmul N dim / stores

    x = node_feats.astype(jnp.float32)
    w_p = jnp.zeros((c_in, c_out_p), jnp.float32).at[:, :c_out].set(
        w.astype(jnp.float32))
    b_p = jnp.zeros((1, c_out_p), jnp.float32).at[0, :c_out].set(
        b.reshape(-1).astype(jnp.float32))

    # Adjacency stream dtype: keep narrow dtypes as-is (bf16 / 8-bit widened
    # to bf16 inside the kernel); only wider floats are cast down here.
    if adjacency.dtype in (jnp.bfloat16, jnp.int8, jnp.uint8):
        adj = adjacency
    else:
        adj = adjacency.astype(jnp.bfloat16)   # 0/1 exact; halves HBM bytes
    adj_bytes = jnp.dtype(adj.dtype).itemsize

    # --- Row tiling of the adjacency --------------------------------------
    assert row_tile % 8 == 0

    def _agg_vmem_need(t):
        return (2 * t * N * adj_bytes          # adjacency tile, double-buffered
                + N * c_out_p * 2              # resident msg (bf16, 1 buffer)
                + 2 * t * c_out_p * 4)         # output tile, double-buffered

    if N <= row_tile:
        tq = N                                 # single tile: block == full dims
    else:
        tq = row_tile
        # Shrink the row tile until the estimated VMEM working set fits.
        # TODO(synk): for very large N the resident msg block (N*c_out_p*2 B)
        # dominates; a neighbor-(K-)tiled variant with an f32 accumulator
        # scratch would make the working set fully N-independent.
        while tq > 8 and _agg_vmem_need(tq) > vmem_budget_bytes:
            tq //= 2

    n_rows_pad = N if N % tq == 0 else _round_up(N, tq)
    num_row_tiles = n_rows_pad // tq

    # Pad adjacency rows only when needed (columns never need padding since the
    # block's last dim equals the full array dim). Padded rows are all zero and
    # their outputs are sliced off below.
    if n_rows_pad != N:
        adj = jnp.pad(adj, ((0, 0), (0, n_rows_pad - N), (0, 0)))

    # --- Kernel 1: projection (once per node, not once per row tile) ------
    tp = tq if N % tq == 0 else N
    npt = N // tp
    msg = pl.pallas_call(
        _project_kernel,
        out_shape=jax.ShapeDtypeStruct((B, N, c_out_p), jnp.bfloat16),
        grid=(B, npt),
        in_specs=[
            pl.BlockSpec((1, tp, c_in), lambda bi, ri: (bi, ri, 0)),
            pl.BlockSpec((c_in, c_out_p), lambda bi, ri: (0, 0),
                         pipeline_mode=pl.Buffered(1)),
            pl.BlockSpec((1, c_out_p), lambda bi, ri: (0, 0),
                         pipeline_mode=pl.Buffered(1)),
        ],
        out_specs=pl.BlockSpec((1, tp, c_out_p), lambda bi, ri: (bi, ri, 0)),
        compiler_params=pltpu.CompilerParams(
            dimension_semantics=("parallel", "parallel")),
    )(x, w_p, b_p)

    # --- Kernel 2: aggregation + mean + ReLU --------------------------------
    vmem_limit = int(min(max(_agg_vmem_need(tq) + 4 * 1024 * 1024,
                             16 * 1024 * 1024),
                         120 * 1024 * 1024))
    out_p = pl.pallas_call(
        _aggregate_kernel,
        out_shape=jax.ShapeDtypeStruct((B, n_rows_pad, c_out_p), jnp.float32),
        grid=(B, num_row_tiles),
        in_specs=[
            pl.BlockSpec((1, tq, N), lambda bi, ri: (bi, ri, 0)),        # adj row tile (stream)
            pl.BlockSpec((1, N, c_out_p), lambda bi, ri: (bi, 0, 0),     # msg (resident per batch)
                         pipeline_mode=pl.Buffered(1)),
        ],
        out_specs=pl.BlockSpec((1, tq, c_out_p), lambda bi, ri: (bi, ri, 0)),
        compiler_params=pltpu.CompilerParams(
            dimension_semantics=("parallel", "parallel"),
            vmem_limit_bytes=vmem_limit),
    )(adj, msg)

    return out_p[:, :N, :c_out]


def gcn_reference(node_feats, adjacency, w, b):
    """Pure-JAX dense reference matching the PyTorch GCNLayer.forward."""
    deg = jnp.sum(adjacency, axis=-1, keepdims=True)                    # (B, N, 1)
    msg = node_feats @ w + b.reshape(1, 1, -1)                          # (B, N, c_out)
    msg = jnp.einsum('bij,bjc->bic', adjacency, msg)                    # torch.bmm
    msg = msg / deg
    return jnp.maximum(msg, 0.0)                                        # ReLU


if __name__ == "__main__":
    B, N, C_IN, C_OUT = 2, 8, 4, 16

    key = jax.random.PRNGKey(0)
    k_x, k_adj, k_w, k_b = jax.random.split(key, 4)

    # nn.Linear-style parameters, stored as (in, out) so we compute x @ W.
    w_bound = 1.0 / jnp.sqrt(jnp.float32(C_IN))
    w = jax.random.uniform(k_w, (C_IN, C_OUT), jnp.float32, -w_bound, w_bound)
    b = jax.random.uniform(k_b, (C_OUT,), jnp.float32, -w_bound, w_bound)

    # Node features + symmetric binary adjacency with self-connections
    # (degree >= 1, so the mean normalization is well defined).
    node_feats = jax.random.normal(k_x, (B, N, C_IN), jnp.float32)
    rand_adj = (jax.random.uniform(k_adj, (B, N, N)) > 0.5).astype(jnp.float32)
    rand_adj = jnp.maximum(rand_adj, jnp.transpose(rand_adj, (0, 2, 1)))
    adjacency = jnp.maximum(rand_adj, jnp.eye(N, dtype=jnp.float32)[None])

    # Hand the adjacency to the kernel already in bf16 (0/1 is exact) so the
    # wrapper performs no extra HBM cast pass over the largest tensor.
    out = gcn_layer(node_feats, adjacency.astype(jnp.bfloat16), w, b)
    out = jax.block_until_ready(out)

    ref = gcn_reference(node_feats, adjacency, w, b)
    assert out.shape == (B, N, C_OUT), out.shape
    # Tolerance covers the bf16 message stream (~2^-9 rel) and the approx
    # (EUP) reciprocal (~2^-12 rel) against the pure-f32 reference.
    assert jnp.allclose(out, ref, atol=1e-2, rtol=1e-2), "mismatch vs reference"

    print("KERNEL_OK")
</pallas_src>

<mosaic_0001>
module attributes {stable_mosaic.version = 11 : i64} {
  func.func @_project_kernel(%arg0: i32, %arg1: i32, %arg2: memref<1x8x4xf32, #tpu.memory_space<vmem>>, %arg3: memref<4x128xf32, #tpu.memory_space<vmem>>, %arg4: memref<1x128xf32, #tpu.memory_space<vmem>>, %arg5: memref<1x8x128xbf16, #tpu.memory_space<vmem>>) attributes {dimension_semantics = [#tpu.dimension_semantics<parallel>, #tpu.dimension_semantics<parallel>], iteration_bounds = array<i64: 2, 1>, scalar_prefetch = 0 : i64, scratch_operands = 0 : i64, tpu.core_type = #tpu.core_type<tc>, window_params = [{transform_indices = @transform_0, window_bounds = array<i64: 1, 8, 4>}, {pipeline_mode = #tpu.pipeline_mode<synchronous>, transform_indices = @transform_1, window_bounds = array<i64: 4, 128>}, {pipeline_mode = #tpu.pipeline_mode<synchronous>, transform_indices = @transform_2, window_bounds = array<i64: 1, 128>}, {transform_indices = @transform_3, window_bounds = array<i64: 1, 8, 128>}]} {
    %c0 = arith.constant 0 : index
    %c0_0 = arith.constant 0 : index
    %c0_1 = arith.constant 0 : index
    %0 = vector.load %arg2[%c0, %c0_0, %c0_1] : memref<1x8x4xf32, #tpu.memory_space<vmem>>, vector<1x8x4xf32>
    %1 = vector.shape_cast %0 : vector<1x8x4xf32> to vector<8x4xf32>
    %c0_2 = arith.constant 0 : index
    %c0_3 = arith.constant 0 : index
    %2 = vector.load %arg3[%c0_2, %c0_3] : memref<4x128xf32, #tpu.memory_space<vmem>>, vector<4x128xf32>
    %cst = arith.constant dense<0.000000e+00> : vector<8x128xf32>
    %3 = tpu.matmul %1, %2, %cst {dimension_numbers = #tpu.dot_dimension_numbers<[1], [0], [0], [1], [0, 0, 1, 1], [], []>} : vector<8x4xf32>, vector<4x128xf32>, vector<8x128xf32> -> vector<8x128xf32>
    %c0_4 = arith.constant 0 : index
    %c0_5 = arith.constant 0 : index
    %4 = vector.load %arg4[%c0_4, %c0_5] : memref<1x128xf32, #tpu.memory_space<vmem>>, vector<1x128xf32>
    %5 = vector.broadcast %4 : vector<1x128xf32> to vector<8x128xf32>
    %6 = arith.addf %3, %5 : vector<8x128xf32>
    %7 = arith.truncf %6 : vector<8x128xf32> to vector<8x128xbf16>
    %c0_6 = arith.constant 0 : index
    %c0_7 = arith.constant 0 : index
    %c0_8 = arith.constant 0 : index
    %8 = vector.load %arg5[%c0_6, %c0_7, %c0_8] : memref<1x8x128xbf16, #tpu.memory_space<vmem>>, vector<1x8x128xbf16>
    %9 = vector.shape_cast %8 : vector<1x8x128xbf16> to vector<8x128xbf16>
    %10 = vector.shape_cast %7 : vector<8x128xbf16> to vector<1x8x128xbf16>
    tpu.vector_store %arg5[%c0_6, %c0_7, %c0_8], %10 {strides = array<i32>} : memref<1x8x128xbf16, #tpu.memory_space<vmem>>, vector<1x8x128xbf16>,
    return
  }
  func.func @transform_0(%arg0: i32, %arg1: i32) -> (i32, i32, i32) {
    %c0_i32 = arith.constant 0 : i32
    %c0_i32_0 = arith.constant 0 : i32
    return %arg0, %arg1, %c0_i32 : i32, i32, i32
  }
  func.func @transform_1(%arg0: i32, %arg1: i32) -> (i32, i32) {
    %c0_i32 = arith.constant 0 : i32
    %c0_i32_0 = arith.constant 0 : i32
    %c0_i32_1 = arith.constant 0 : i32
    return %c0_i32, %c0_i32_0 : i32, i32
  }
  func.func @transform_2(%arg0: i32, %arg1: i32) -> (i32, i32) {
    %c0_i32 = arith.constant 0 : i32
    %c0_i32_0 = arith.constant 0 : i32
    %c0_i32_1 = arith.constant 0 : i32
    return %c0_i32, %c0_i32_0 : i32, i32
  }
  func.func @transform_3(%arg0: i32, %arg1: i32) -> (i32, i32, i32) {
    %c0_i32 = arith.constant 0 : i32
    %c0_i32_0 = arith.constant 0 : i32
    return %arg0, %arg1, %c0_i32 : i32, i32, i32
  }
}

</mosaic_0001>

<bundles_post_ra>
// kernel: tpu_custom_call.1
= control target key start
LH: loop header
LB: loop body
LE: loop exit
PB: predicated region body
PF: predicated region fallthrough
CT: control target
= control target key end

     0   :  { %8 = vsyncpa [#allocation3], 0  ;;  %s665_s0 = inlined_call_operand.vmem [shape: f32[2,8,4], index: 0, kind: input, shape index: {}]   ;;  %s666_s1 = inlined_call_operand.vmem [shape: f32[4,128], index: 1, kind: input, shape index: {}]   ;;  %s667_s2 = inlined_call_operand.vmem [shape: f32[1,128], index: 2, kind: input, shape index: {}]   ;;  %s668_s3 = inlined_call_operand.hbm [shape: bf16[2,8,128], index: 3, kind: output, shape index: {}]  }
   0x1   :  { %10 = vsyncpa [#allocation3 + $0x1], 0  ;;  %s547_s12 = smov 0   ;;  %s549_s13 = smov 0  }
   0x2   :  { %s551_s14 = smov 0   ;;  %s553_s15 = smov 0  }
   0x3   :  { %s555_s16 = smov 0   ;;  %s557_s17 = smov 0  }
   0x4 LB: > { %s366_s18 = sadd.s32 4294967295, %s522_s17   ;;  %s367_s19 = sadd.s32 4294967294, %s522_s17   ;;  %s522_s17 = sphi %s557_s17, %s16_s17   ;;  %s518_s16 = sphi %s555_s16, %s675_s16   ;;  %s514_s15 = sphi %s553_s15, %s674_s15   ;;  %s510_s14 = sphi %s551_s14, %s673_s14   ;;  %s506_s13 = sphi %s549_s13, %s672_s13   ;;  %s502_s12 = sphi %s547_s12, %s671_s12  }
   0x5   : > { %s28_s20 = sadd.s32 1, %s518_s16  ;;  %s107_s21 = sadd.s32 1, %s510_s14 }
   0x6   : > { %p30_p0 = scmp.ge.s32.totalorder %s28_s20, 2  ;;  %p117_p1 = scmp.ne.s32.totalorder %s510_s14, %s506_s13 }
   0x7   : > { %p118_p2 = scmp.eq.s32.totalorder %s366_s18, 1  ;;  %p123_p3 = scmp.ne.s32.totalorder %s506_s13, %s502_s12 }
   0x8   : > { %s677_s20 = smov (%p30_p0, %s28_s20), 0  ;;  %p124_p5 = scmp.eq.s32.totalorder %s367_s19, 1 }
   0x9   : > { %p587_p4 = por %p118_p2, %p117_p1  ;;  %s102_s23 = ssub.s32 %s518_s16, %s677_s20 }
   0xa   : > { %p370_p6 = scmp.ge.s32.totalorder %s522_s17, 1  ;;  %p105_p7 = scmp.eq.s32.totalorder %s102_s23, 0 }
   0xb   : > { %p594_p8 = por %p124_p5, %p123_p3  ;;  %p158_p9 = scmp.lt.s32.totalorder %s522_s17, 3 }
   0xc   : > { %s600_s25 = scalar_select %p105_p7, %s510_s14, %s107_s21  }
   0xd   : > { %p159_p10 = pnand %p370_p6, %p158_p9 }
   0xe   : > { %v192_v0 = vld [vmem:[%s666_s1] sm:$0xf] (!%p159_p10)  ;;  %vm204_vm0 = vcmask (!%p159_p10), 1043456   ;;  %p184_p11 = scmp.lt.s32.totalorder (!%p159_p10), %s514_s15, 1  ;;  %v524_v1 = vmov (!%p159_p10), 0.0   ;;  %vm525_vm1 = vmmov (!%p159_p10), 0  }
   0xf   : > { %162 = sbr.rel (%p159_p10) target bundleno = 257 (0x101), region = 32  ;;  %382 = vmatprep.subr.mxu0 (!%p159_p10), %v524_v1  ;;  %384 = vmatprep.mubr.msk.f32.mxu0 (!%p159_p10), %vm525_vm1, %v524_v1  ;;  %vm200_vm2 = vcmask (!%p159_p10), 31744   ;;  %s181_s6 = sand.u32 (!%p159_p10), 1, %s506_s13   ;;  %v373_v3 = vld [vmem:[%s667_s2] ss:$0 sm:$0xff] (!%p159_p10) }
  0x10   : > { %383 = vmatpush3.msk.msra.mxu0 (!%p159_p10), %vm204_vm0, %v192_v0  ;;  %s371_s7 = sshll.u32 (!%p159_p10), %s181_s6, 2  ;;  %s377_s10 = sshll.u32 (!%p159_p10), %s514_s15, 6 }
  0x11   : > { %s183_s11 = scalar_lea.vmem (!%p159_p10), [#allocation2], %s371_s7  ;;  %s618_s23 = scalar_lea.hbm (!%p159_p10), %s668_s3, %s377_s10 }
  0x12   : > { %s295_s18 = sshll.u32 (!%p159_p10), %s183_s11, 4  ;;  %s281_s26 = scalar_lea.sflag (!%p159_p10), [#allocation3], %s181_s6  ;;  %s620_s18 = int_to_ptr.vmem [resolvable:$true] %s295_s18 }
  0x13   : > { %s444_s27 = scalar_lea.vmem (!%p159_p10), %s620_s18, 64 }
  0x14   : > { %p445_p12 = scmp.ne.s32.totalorder (!%p159_p10), %s620_s18, %s444_s27 }
  0x16   : > { %s185_s28 = scalar_select %p184_p11, %s514_s15, 1 }
  0x17   : > { %p446_p13 = pnand %p445_p12, %p587_p4  ;;  %s526_s15 = smov [#allocation2]  }
  0x18   : > { %s372_s29 = sshll.u32 %s185_s28, 3  ;;  %s448_s28 = sshll.u32 %s526_s15, 4  ;;  %s449_s28 = int_to_ptr.vmem [resolvable:$false] %s448_s28 }
  0x19   : > { %s190_s5 = scalar_lea.vmem %s665_s0, %s372_s29  ;;  %p447_p0 = pneg %p446_p13 }
  0x1a   : > { %v191_v2 = vld [vmem:[%s190_s5] sm:$0xff]  ;;  %s450_s29 = scalar_lea.vmem %s449_s28, 128  ;;  %p451_p1 = scmp.lt.s32.totalorder %s620_s18, %s449_s28 }
  0x1b   : > { %385 = vmatmul.mubr.msk.f32.vlgmr.msra.gmra.mrb[0].mxu0 %vm200_vm2, %v191_v2  ;;  %p452_p2 = scmp.lt.s32.totalorder %s450_s29, %s444_s27 }
  0x1d   : > { %p453_p3 = por %p452_p2, %p451_p1 }
  0x1f   : > { %p454_p5 = pnand %p453_p3, %p447_p0 }
  0xee   : > { %v274_v4 = vpop.f32.mrb[0].mxu0 }
  0xef   : > { %v275_v5 = vadd.f32 %v373_v3, %v274_v4  ;;  %v386_v6 = vpop.f32.mrb[1].mxu0 }
  0xf1   : > { %v278_v7 = vpack.c.bf16 %v275_v5, %v275_v5 }
  0xf3   : > { %279 = vst [vmem:[%s183_s11] sm:$0xf] %v278_v7 }
  0xf4   : > { %457 = shalt.err (!%p454_p5)
}
  0xf5   : > { %s458_s30 = scalar_lea.hbm %s618_s23, 64  ;;  %s462_s6 = scalar_lea.hbm %s668_s3, 128 }
  0xf6   : > { %p459_p6 = scmp.ne.s32.totalorder %s618_s23, %s458_s30  ;;  %p463_p10 = scmp.lt.u32.totalorder %s618_s23, %s668_s3 }
  0xf7   : > { %p464_p11 = scmp.lt.u32.totalorder %s462_s6, %s458_s30  ;;  %p466_p13 = scmp.lt.u32.totalorder %s458_s30, %s618_s23 }
  0xf8   : > { %p460_p7 = pnand %p459_p6, %p587_p4 }
  0xf9   : > { %p465_p12 = por %p464_p11, %p463_p10 }
  0xfa   : > { %p461_p9 = pneg %p460_p7 }
  0xfb   : > { %p467_p0 = por %p466_p13, %p465_p12 }
  0xfd   : > { %p468_p1 = pnand %p467_p0, %p461_p9 }
  0xff   : > { %471 = shalt.err (!%p468_p1)
}
 0x100   : > { %387 = dma.vmem_to_hbm [thread:$0]  (%p587_p4), %s620_s18, 64, %s618_s23, %s281_s26  }
 0x101 PF: > { %p393_p2 = scmp.ge.s32.totalorder %s522_s17, 2  ;;  %s307_s9 = sand.u32 1, %s502_s12  }
 0x102   : > { %s308_s10 = scalar_lea.sflag [#allocation3], %s307_s9 }
 0x103   : > { %p390_p3 = pnand %p393_p2, %p594_p8 }
 0x105   : > { %497 = dma.done.wait (!%p390_p3), %s308_s10, 64  }
 0x106   : > { %499 = vsyncadd (!%p390_p3), %s308_s10, 4294967232  ;;  %s16_s17 = sadd.s32 1, %s522_s17   ;;  %s671_s12 = smov %s506_s13 }
 0x107   : > { %p13_p5 = scmp.ge.s32.totalorder %s16_s17, 4   ;;  %s672_s13 = smov %s510_s14 }
 0x108   : > { %s673_s14 = smov %s600_s25  ;;  %s674_s15 = smov %s518_s16 }
 0x109   : > { %s675_s16 = smov %s677_s20  ;;  %15 = sbr.rel (!%p13_p5) target bundleno = 4 (0x4), region = 67 }
 0x110   :  { %313 = vsyncpa [#allocation3], 1 }
 0x111   :  { %315 = vsyncpa [#allocation3 + $0x1], 1 }

</bundles_post_ra>
